<compile_context>
chip_gen: v7x
topology: tpu7x:2x2x1
jax: 0.10.0
libtpu: 0.0.40
codegen_flags: <defaults>
</compile_context>

<pallas_src>
import functools

import jax
import jax.numpy as jnp
from jax import lax
from jax.experimental import pallas as pl
from jax.experimental.pallas import tpu as pltpu


# ---------------------------------------------------------------------------
# tile selection helpers
# ---------------------------------------------------------------------------
def _largest_div(n, cap, quantum=8):
    """Largest divisor of `n` that is a multiple of `quantum` and <= cap."""
    t = (min(cap, n) // quantum) * quantum
    while t >= quantum:
        if n % t == 0:
            return t
        t -= quantum
    return None


def _pick_tiles(seq, d, itemsize, max_tile_tokens, max_gather_tile, vmem_budget):
    """Pick (TS tokens per grid step, TM tokens per gather sub-tile)."""
    # ~6 resident copies of a (TS, D) tile: double-buffered output block,
    # double-buffered position block, 2-slot gather landing buffers.
    fit = max(8, vmem_budget // max(1, 6 * d * itemsize))
    cap = max(8, min(max_tile_tokens, fit))
    ts = _largest_div(seq, cap) or seq                     # ts always divides seq
    tm = _largest_div(ts, min(max_gather_tile, ts)) or ts  # tm always divides ts
    return ts, tm


# ---------------------------------------------------------------------------
# kernels
# ---------------------------------------------------------------------------
def _embed_arange_kernel(tok_ref, wte_hbm, wpe_ref, out_ref, wbuf, sem,
                         *, tm, unroll):
    """Fast path: position_ids is arange -> position tile comes via BlockSpec.

    tok_ref : SMEM int32[b*s]      scalar-prefetched flat token ids
    wte_hbm : HBM   [vocab, D]     word embedding table (pl.ANY)
    wpe_ref : VMEM  [TS, D]        contiguous slice of the position table
    out_ref : VMEM  [1, TS, D]     output tile
    wbuf    : VMEM  [2, TM, D]     double-buffered gather landing buffer
    sem     : DMA semaphores [2]   one aggregated semaphore per slot
    """
    bi = pl.program_id(0)
    j = pl.program_id(1)
    nj = pl.num_programs(1)
    ts = wpe_ref.shape[0]
    nsub = ts // tm
    base = (bi * nj + j) * ts  # flat token offset of this (bi, j) tile

    def issue(sub, slot):
        off = base + sub * tm

        def body(t, carry):
            row = tok_ref[off + t]
            pltpu.make_async_copy(
                wte_hbm.at[pl.ds(row, 1)],
                wbuf.at[slot, pl.ds(t, 1)],
                sem.at[slot],
            ).start()
            return carry

        lax.fori_loop(0, tm, body, 0, unroll=unroll)

    def wait(slot):
        # Aggregate wait: TM row copies of D elems each == full (TM, D) buffer.
        pltpu.make_async_copy(wbuf.at[slot], wbuf.at[slot], sem.at[slot]).wait()

    issue(0, 0)
    for sub in range(nsub):          # nsub is small and static
        slot = sub % 2
        if sub + 1 < nsub:           # prefetch next sub-tile before draining
            issue(sub + 1, 1 - slot)
        wait(slot)
        o = sub * tm
        w = wbuf[slot].astype(out_ref.dtype)
        p = wpe_ref[pl.ds(o, tm), :].astype(out_ref.dtype)
        out_ref[0, pl.ds(o, tm), :] = w + p


def _embed_gather_kernel(tok_ref, pos_ref, wte_hbm, wpe_hbm, out_ref,
                         wbuf, pbuf, sem, *, tm, unroll):
    """General path: explicit position_ids -> row-gather both tables.

    tok_ref/pos_ref : SMEM int32[b*s]   scalar-prefetched flat ids
    wte_hbm/wpe_hbm : HBM tables (pl.ANY)
    out_ref         : VMEM [1, TS, D]
    wbuf/pbuf       : VMEM [2, TM, D]   double-buffered landing buffers
    sem             : DMA semaphores [2, 2]  (slot, table)
    """
    bi = pl.program_id(0)
    j = pl.program_id(1)
    nj = pl.num_programs(1)
    ts = out_ref.shape[1]
    nsub = ts // tm
    base = (bi * nj + j) * ts

    def issue(sub, slot):
        off = base + sub * tm

        def body(t, carry):
            tok = tok_ref[off + t]
            pos = pos_ref[off + t]
            pltpu.make_async_copy(
                wte_hbm.at[pl.ds(tok, 1)],
                wbuf.at[slot, pl.ds(t, 1)],
                sem.at[slot, 0],
            ).start()
            pltpu.make_async_copy(
                wpe_hbm.at[pl.ds(pos, 1)],
                pbuf.at[slot, pl.ds(t, 1)],
                sem.at[slot, 1],
            ).start()
            return carry

        lax.fori_loop(0, tm, body, 0, unroll=unroll)

    def wait(slot):
        # One aggregated wait per table per slot, sized to the buffer that the
        # row-DMAs actually filled (matching dtype / byte counts).
        pltpu.make_async_copy(wbuf.at[slot], wbuf.at[slot], sem.at[slot, 0]).wait()
        pltpu.make_async_copy(pbuf.at[slot], pbuf.at[slot], sem.at[slot, 1]).wait()

    issue(0, 0)
    for sub in range(nsub):
        slot = sub % 2
        if sub + 1 < nsub:
            issue(sub + 1, 1 - slot)
        wait(slot)
        o = sub * tm
        out_ref[0, pl.ds(o, tm), :] = (
            wbuf[slot].astype(out_ref.dtype) + pbuf[slot].astype(out_ref.dtype)
        )


# ---------------------------------------------------------------------------
# wrapper
# ---------------------------------------------------------------------------
def gpt_embeddings_forward(tokens, word_embeddings, position_embeddings,
                           position_ids=None, attention_mask=None, labels=None,
                           *, combine_batch_seqlen_dim=False,
                           max_tile_tokens=512, max_gather_tile=128,
                           unroll=8, vmem_budget_bytes=16 * 1024 * 1024):
    """tokens: [b, s] int; tables: [vocab, D] / [max_pos, D] -> [b, s, D]."""
    del attention_mask, labels  # accepted (as in the reference) but unused

    b, s = tokens.shape
    vocab, d = word_embeddings.shape
    max_pos, d2 = position_embeddings.shape
    if d != d2:
        raise ValueError("embedding dims of the two tables must match")

    out_dtype = jnp.promote_types(word_embeddings.dtype, position_embeddings.dtype)
    itemsize = max(jnp.dtype(word_embeddings.dtype).itemsize,
                   jnp.dtype(position_embeddings.dtype).itemsize,
                   jnp.dtype(out_dtype).itemsize)

    ts, tm = _pick_tiles(s, d, itemsize, max_tile_tokens, max_gather_tile,
                         vmem_budget_bytes)
    num_j = s // ts
    unroll = max(1, min(unroll, tm))

    tok_flat = tokens.reshape(-1).astype(jnp.int32)

    compiler_params = pltpu.CompilerParams(
        dimension_semantics=("parallel", "parallel"),  # tiles split across TCs
        vmem_limit_bytes=32 * 1024 * 1024,
    )

    # arange fast path needs ts to be a legal second-to-last block dim of wpe.
    use_arange_fast_path = (position_ids is None) and (ts % 8 == 0 or ts == max_pos)

    if use_arange_fast_path:
        if s > max_pos:
            raise ValueError("sequence length exceeds the position table")
        kernel = functools.partial(_embed_arange_kernel, tm=tm, unroll=unroll)
        out = pl.pallas_call(
            kernel,
            out_shape=jax.ShapeDtypeStruct((b, s, d), out_dtype),
            grid_spec=pltpu.PrefetchScalarGridSpec(
                num_scalar_prefetch=1,
                grid=(b, num_j),
                in_specs=[
                    pl.BlockSpec(memory_space=pl.ANY),               # word table
                    pl.BlockSpec((ts, d), lambda bi, j, tok: (j, 0)),  # pos tile
                ],
                out_specs=pl.BlockSpec((1, ts, d), lambda bi, j, tok: (bi, j, 0)),
                scratch_shapes=[
                    pltpu.VMEM((2, tm, d), word_embeddings.dtype),
                    pltpu.SemaphoreType.DMA((2,)),
                ],
            ),
            compiler_params=compiler_params,
        )(tok_flat, word_embeddings, position_embeddings)
    else:
        if position_ids is None:
            position_ids = jnp.arange(s, dtype=jnp.int32)[None, :]
        pos_flat = jnp.broadcast_to(
            position_ids.astype(jnp.int32), (b, s)).reshape(-1)
        kernel = functools.partial(_embed_gather_kernel, tm=tm, unroll=unroll)
        out = pl.pallas_call(
            kernel,
            out_shape=jax.ShapeDtypeStruct((b, s, d), out_dtype),
            grid_spec=pltpu.PrefetchScalarGridSpec(
                num_scalar_prefetch=2,
                grid=(b, num_j),
                in_specs=[
                    pl.BlockSpec(memory_space=pl.ANY),   # word table in HBM
                    pl.BlockSpec(memory_space=pl.ANY),   # position table in HBM
                ],
                out_specs=pl.BlockSpec((1, ts, d),
                                       lambda bi, j, tok, pos: (bi, j, 0)),
                scratch_shapes=[
                    pltpu.VMEM((2, tm, d), word_embeddings.dtype),
                    pltpu.VMEM((2, tm, d), position_embeddings.dtype),
                    pltpu.SemaphoreType.DMA((2, 2)),
                ],
            ),
            compiler_params=compiler_params,
        )(tok_flat, pos_flat, word_embeddings, position_embeddings)

    if combine_batch_seqlen_dim:
        # sequence-parallel path of the reference returns (b*s, d)
        return out.reshape(b * s, d)
    return out


# ---------------------------------------------------------------------------
# self-test
# ---------------------------------------------------------------------------
if __name__ == "__main__":
    key = jax.random.PRNGKey(0)
    k1, k2, k3, k4, k5, k6 = jax.random.split(key, 6)

    # --- config A: tiny, exercises the arange fast path (single sub-tile) ---
    b, s, vocab, max_pos, d = 2, 8, 512, 32, 128
    tokens = jax.random.randint(k1, (b, s), 0, vocab, dtype=jnp.int32)
    wte = 0.02 * jax.random.normal(k2, (vocab, d), dtype=jnp.float32)
    wpe = 0.01 * jax.random.normal(k3, (max_pos, d), dtype=jnp.float32)

    out_a = jax.jit(gpt_embeddings_forward)(tokens, wte, wpe)
    jax.block_until_ready(out_a)
    ref_a = wte[tokens] + wpe[jnp.arange(s)][None, :, :]
    assert out_a.shape == (b, s, d)
    assert jnp.allclose(out_a, ref_a, rtol=1e-6, atol=1e-6), float(
        jnp.max(jnp.abs(out_a - ref_a)))

    # --- config B: longer seq -> double-buffered multi-sub-tile gather path ---
    b2, s2, vocab2, max_pos2, d2 = 2, 256, 1000, 512, 128
    tokens2 = jax.random.randint(k4, (b2, s2), 0, vocab2, dtype=jnp.int32)
    wte2 = 0.02 * jax.random.normal(k5, (vocab2, d2), dtype=jnp.float32)
    wpe2 = 0.01 * jax.random.normal(k6, (max_pos2, d2), dtype=jnp.float32)

    out_b = jax.jit(gpt_embeddings_forward)(tokens2, wte2, wpe2)
    jax.block_until_ready(out_b)
    ref_b = wte2[tokens2] + wpe2[jnp.arange(s2)][None, :, :]
    assert jnp.allclose(out_b, ref_b, rtol=1e-6, atol=1e-6), float(
        jnp.max(jnp.abs(out_b - ref_b)))

    # --- config C: explicit position_ids -> generic row-gather kernel ---
    pos_ids = ((jnp.arange(s2, dtype=jnp.int32) * 7 + 3) % max_pos2)[None, :]
    out_c = jax.jit(gpt_embeddings_forward)(tokens2, wte2, wpe2, pos_ids)
    jax.block_until_ready(out_c)
    ref_c = wte2[tokens2] + wpe2[pos_ids[0]][None, :, :]
    assert jnp.allclose(out_c, ref_c, rtol=1e-6, atol=1e-6), float(
        jnp.max(jnp.abs(out_c - ref_c)))

    # --- config D: sequence-parallel flattened output shape check ---
    out_d = jax.jit(functools.partial(
        gpt_embeddings_forward, combine_batch_seqlen_dim=True))(tokens, wte, wpe)
    jax.block_until_ready(out_d)
    assert out_d.shape == (b * s, d)
    assert jnp.allclose(out_d, ref_a.reshape(b * s, d), rtol=1e-6, atol=1e-6)

    print("KERNEL_OK")
</pallas_src>

<mosaic_0001>
module attributes {stable_mosaic.version = 11 : i64} {
  func.func @_embed_arange_kernel(%arg0: i32, %arg1: i32, %arg2: memref<16xi32, #tpu.memory_space<smem>>, %arg3: memref<512x128xf32, #tpu.memory_space<any>>, %arg4: memref<8x128xf32, #tpu.memory_space<vmem>>, %arg5: memref<1x8x128xf32, #tpu.memory_space<vmem>>, %arg6: memref<2x8x128xf32, #tpu.memory_space<vmem>>, %arg7: memref<2x!tpu.dma_semaphore, #tpu.memory_space<semaphore_mem>>) attributes {dimension_semantics = [#tpu.dimension_semantics<parallel>, #tpu.dimension_semantics<parallel>], iteration_bounds = array<i64: 2, 1>, scalar_prefetch = 1 : i64, scratch_operands = 2 : i64, tpu.core_type = #tpu.core_type<tc>, window_params = [{}, {transform_indices = @transform_1, window_bounds = array<i64: 8, 128>}, {transform_indices = @transform_2, window_bounds = array<i64: 1, 8, 128>}]} {
    %c1_i32 = arith.constant 1 : i32
    %0 = arith.muli %arg0, %c1_i32 : i32
    %1 = arith.addi %0, %arg1 : i32
    %c8_i32 = arith.constant 8 : i32
    %2 = arith.muli %1, %c8_i32 : i32
    %c0_i32 = arith.constant 0 : i32
    %3 = arith.addi %2, %c0_i32 : i32
    %c0_i32_0 = arith.constant 0 : i32
    %4 = arith.addi %3, %c0_i32_0 : i32
    %5 = arith.index_cast %4 : i32 to index
    %6 = memref.load %arg2[%5] : memref<16xi32, #tpu.memory_space<smem>>
    %c0_i32_1 = arith.constant 0 : i32
    %c0_i32_2 = arith.constant 0 : i32
    %c0_i32_3 = arith.constant 0 : i32
    %7 = tpu.memref_slice %arg3[%6, %c0_i32_3] : memref<512x128xf32, #tpu.memory_space<any>> -> memref<1x128xf32, #tpu.memory_space<any>>
    %c0_i32_4 = arith.constant 0 : i32
    %8 = tpu.memref_slice %arg6[%c0_i32_1, %c0_i32_0, %c0_i32_4] : memref<2x8x128xf32, #tpu.memory_space<vmem>> -> memref<1x1x128xf32, #tpu.memory_space<vmem>>
    %9 = tpu.memref_squeeze %8 : memref<1x1x128xf32, #tpu.memory_space<vmem>> -> memref<1x128xf32, #tpu.memory_space<vmem>>
    %10 = tpu.memref_slice %arg7[%c0_i32_2] : memref<2x!tpu.dma_semaphore, #tpu.memory_space<semaphore_mem>> -> memref<1x!tpu.dma_semaphore, #tpu.memory_space<semaphore_mem>>
    %11 = tpu.memref_squeeze %10 : memref<1x!tpu.dma_semaphore, #tpu.memory_space<semaphore_mem>> -> memref<!tpu.dma_semaphore, #tpu.memory_space<semaphore_mem>>
    tpu.enqueue_dma source(%7 : memref<1x128xf32, #tpu.memory_space<any>>) target(%9 : memref<1x128xf32, #tpu.memory_space<vmem>>) target_semaphore(%11 : memref<!tpu.dma_semaphore, #tpu.memory_space<semaphore_mem>>)
    %c1_i32_5 = arith.constant 1 : i32
    %12 = arith.addi %3, %c1_i32_5 : i32
    %13 = arith.index_cast %12 : i32 to index
    %14 = memref.load %arg2[%13] : memref<16xi32, #tpu.memory_space<smem>>
    %c0_i32_6 = arith.constant 0 : i32
    %c0_i32_7 = arith.constant 0 : i32
    %c0_i32_8 = arith.constant 0 : i32
    %15 = tpu.memref_slice %arg3[%14, %c0_i32_8] : memref<512x128xf32, #tpu.memory_space<any>> -> memref<1x128xf32, #tpu.memory_space<any>>
    %c0_i32_9 = arith.constant 0 : i32
    %16 = tpu.memref_slice %arg6[%c0_i32_6, %c1_i32_5, %c0_i32_9] : memref<2x8x128xf32, #tpu.memory_space<vmem>> -> memref<1x1x128xf32, #tpu.memory_space<vmem>>
    %17 = tpu.memref_squeeze %16 : memref<1x1x128xf32, #tpu.memory_space<vmem>> -> memref<1x128xf32, #tpu.memory_space<vmem>>
    %18 = tpu.memref_slice %arg7[%c0_i32_7] : memref<2x!tpu.dma_semaphore, #tpu.memory_space<semaphore_mem>> -> memref<1x!tpu.dma_semaphore, #tpu.memory_space<semaphore_mem>>
    %19 = tpu.memref_squeeze %18 : memref<1x!tpu.dma_semaphore, #tpu.memory_space<semaphore_mem>> -> memref<!tpu.dma_semaphore, #tpu.memory_space<semaphore_mem>>
    tpu.enqueue_dma source(%15 : memref<1x128xf32, #tpu.memory_space<any>>) target(%17 : memref<1x128xf32, #tpu.memory_space<vmem>>) target_semaphore(%19 : memref<!tpu.dma_semaphore, #tpu.memory_space<semaphore_mem>>)
    %c2_i32 = arith.constant 2 : i32
    %20 = arith.addi %3, %c2_i32 : i32
    %21 = arith.index_cast %20 : i32 to index
    %22 = memref.load %arg2[%21] : memref<16xi32, #tpu.memory_space<smem>>
    %c0_i32_10 = arith.constant 0 : i32
    %c0_i32_11 = arith.constant 0 : i32
    %c0_i32_12 = arith.constant 0 : i32
    %23 = tpu.memref_slice %arg3[%22, %c0_i32_12] : memref<512x128xf32, #tpu.memory_space<any>> -> memref<1x128xf32, #tpu.memory_space<any>>
    %c0_i32_13 = arith.constant 0 : i32
    %24 = tpu.memref_slice %arg6[%c0_i32_10, %c2_i32, %c0_i32_13] : memref<2x8x128xf32, #tpu.memory_space<vmem>> -> memref<1x1x128xf32, #tpu.memory_space<vmem>>
    %25 = tpu.memref_squeeze %24 : memref<1x1x128xf32, #tpu.memory_space<vmem>> -> memref<1x128xf32, #tpu.memory_space<vmem>>
    %26 = tpu.memref_slice %arg7[%c0_i32_11] : memref<2x!tpu.dma_semaphore, #tpu.memory_space<semaphore_mem>> -> memref<1x!tpu.dma_semaphore, #tpu.memory_space<semaphore_mem>>
    %27 = tpu.memref_squeeze %26 : memref<1x!tpu.dma_semaphore, #tpu.memory_space<semaphore_mem>> -> memref<!tpu.dma_semaphore, #tpu.memory_space<semaphore_mem>>
    tpu.enqueue_dma source(%23 : memref<1x128xf32, #tpu.memory_space<any>>) target(%25 : memref<1x128xf32, #tpu.memory_space<vmem>>) target_semaphore(%27 : memref<!tpu.dma_semaphore, #tpu.memory_space<semaphore_mem>>)
    %c3_i32 = arith.constant 3 : i32
    %28 = arith.addi %3, %c3_i32 : i32
    %29 = arith.index_cast %28 : i32 to index
    %30 = memref.load %arg2[%29] : memref<16xi32, #tpu.memory_space<smem>>
    %c0_i32_14 = arith.constant 0 : i32
    %c0_i32_15 = arith.constant 0 : i32
    %c0_i32_16 = arith.constant 0 : i32
    %31 = tpu.memref_slice %arg3[%30, %c0_i32_16] : memref<512x128xf32, #tpu.memory_space<any>> -> memref<1x128xf32, #tpu.memory_space<any>>
    %c0_i32_17 = arith.constant 0 : i32
    %32 = tpu.memref_slice %arg6[%c0_i32_14, %c3_i32, %c0_i32_17] : memref<2x8x128xf32, #tpu.memory_space<vmem>> -> memref<1x1x128xf32, #tpu.memory_space<vmem>>
    %33 = tpu.memref_squeeze %32 : memref<1x1x128xf32, #tpu.memory_space<vmem>> -> memref<1x128xf32, #tpu.memory_space<vmem>>
    %34 = tpu.memref_slice %arg7[%c0_i32_15] : memref<2x!tpu.dma_semaphore, #tpu.memory_space<semaphore_mem>> -> memref<1x!tpu.dma_semaphore, #tpu.memory_space<semaphore_mem>>
    %35 = tpu.memref_squeeze %34 : memref<1x!tpu.dma_semaphore, #tpu.memory_space<semaphore_mem>> -> memref<!tpu.dma_semaphore, #tpu.memory_space<semaphore_mem>>
    tpu.enqueue_dma source(%31 : memref<1x128xf32, #tpu.memory_space<any>>) target(%33 : memref<1x128xf32, #tpu.memory_space<vmem>>) target_semaphore(%35 : memref<!tpu.dma_semaphore, #tpu.memory_space<semaphore_mem>>)
    %c4_i32 = arith.constant 4 : i32
    %36 = arith.addi %3, %c4_i32 : i32
    %37 = arith.index_cast %36 : i32 to index
    %38 = memref.load %arg2[%37] : memref<16xi32, #tpu.memory_space<smem>>
    %c0_i32_18 = arith.constant 0 : i32
    %c0_i32_19 = arith.constant 0 : i32
    %c0_i32_20 = arith.constant 0 : i32
    %39 = tpu.memref_slice %arg3[%38, %c0_i32_20] : memref<512x128xf32, #tpu.memory_space<any>> -> memref<1x128xf32, #tpu.memory_space<any>>
    %c0_i32_21 = arith.constant 0 : i32
    %40 = tpu.memref_slice %arg6[%c0_i32_18, %c4_i32, %c0_i32_21] : memref<2x8x128xf32, #tpu.memory_space<vmem>> -> memref<1x1x128xf32, #tpu.memory_space<vmem>>
    %41 = tpu.memref_squeeze %40 : memref<1x1x128xf32, #tpu.memory_space<vmem>> -> memref<1x128xf32, #tpu.memory_space<vmem>>
    %42 = tpu.memref_slice %arg7[%c0_i32_19] : memref<2x!tpu.dma_semaphore, #tpu.memory_space<semaphore_mem>> -> memref<1x!tpu.dma_semaphore, #tpu.memory_space<semaphore_mem>>
    %43 = tpu.memref_squeeze %42 : memref<1x!tpu.dma_semaphore, #tpu.memory_space<semaphore_mem>> -> memref<!tpu.dma_semaphore, #tpu.memory_space<semaphore_mem>>
    tpu.enqueue_dma source(%39 : memref<1x128xf32, #tpu.memory_space<any>>) target(%41 : memref<1x128xf32, #tpu.memory_space<vmem>>) target_semaphore(%43 : memref<!tpu.dma_semaphore, #tpu.memory_space<semaphore_mem>>)
    %c5_i32 = arith.constant 5 : i32
    %44 = arith.addi %3, %c5_i32 : i32
    %45 = arith.index_cast %44 : i32 to index
    %46 = memref.load %arg2[%45] : memref<16xi32, #tpu.memory_space<smem>>
    %c0_i32_22 = arith.constant 0 : i32
    %c0_i32_23 = arith.constant 0 : i32
    %c0_i32_24 = arith.constant 0 : i32
    %47 = tpu.memref_slice %arg3[%46, %c0_i32_24] : memref<512x128xf32, #tpu.memory_space<any>> -> memref<1x128xf32, #tpu.memory_space<any>>
    %c0_i32_25 = arith.constant 0 : i32
    %48 = tpu.memref_slice %arg6[%c0_i32_22, %c5_i32, %c0_i32_25] : memref<2x8x128xf32, #tpu.memory_space<vmem>> -> memref<1x1x128xf32, #tpu.memory_space<vmem>>
    %49 = tpu.memref_squeeze %48 : memref<1x1x128xf32, #tpu.memory_space<vmem>> -> memref<1x128xf32, #tpu.memory_space<vmem>>
    %50 = tpu.memref_slice %arg7[%c0_i32_23] : memref<2x!tpu.dma_semaphore, #tpu.memory_space<semaphore_mem>> -> memref<1x!tpu.dma_semaphore, #tpu.memory_space<semaphore_mem>>
    %51 = tpu.memref_squeeze %50 : memref<1x!tpu.dma_semaphore, #tpu.memory_space<semaphore_mem>> -> memref<!tpu.dma_semaphore, #tpu.memory_space<semaphore_mem>>
    tpu.enqueue_dma source(%47 : memref<1x128xf32, #tpu.memory_space<any>>) target(%49 : memref<1x128xf32, #tpu.memory_space<vmem>>) target_semaphore(%51 : memref<!tpu.dma_semaphore, #tpu.memory_space<semaphore_mem>>)
    %c6_i32 = arith.constant 6 : i32
    %52 = arith.addi %3, %c6_i32 : i32
    %53 = arith.index_cast %52 : i32 to index
    %54 = memref.load %arg2[%53] : memref<16xi32, #tpu.memory_space<smem>>
    %c0_i32_26 = arith.constant 0 : i32
    %c0_i32_27 = arith.constant 0 : i32
    %c0_i32_28 = arith.constant 0 : i32
    %55 = tpu.memref_slice %arg3[%54, %c0_i32_28] : memref<512x128xf32, #tpu.memory_space<any>> -> memref<1x128xf32, #tpu.memory_space<any>>
    %c0_i32_29 = arith.constant 0 : i32
    %56 = tpu.memref_slice %arg6[%c0_i32_26, %c6_i32, %c0_i32_29] : memref<2x8x128xf32, #tpu.memory_space<vmem>> -> memref<1x1x128xf32, #tpu.memory_space<vmem>>
    %57 = tpu.memref_squeeze %56 : memref<1x1x128xf32, #tpu.memory_space<vmem>> -> memref<1x128xf32, #tpu.memory_space<vmem>>
    %58 = tpu.memref_slice %arg7[%c0_i32_27] : memref<2x!tpu.dma_semaphore, #tpu.memory_space<semaphore_mem>> -> memref<1x!tpu.dma_semaphore, #tpu.memory_space<semaphore_mem>>
    %59 = tpu.memref_squeeze %58 : memref<1x!tpu.dma_semaphore, #tpu.memory_space<semaphore_mem>> -> memref<!tpu.dma_semaphore, #tpu.memory_space<semaphore_mem>>
    tpu.enqueue_dma source(%55 : memref<1x128xf32, #tpu.memory_space<any>>) target(%57 : memref<1x128xf32, #tpu.memory_space<vmem>>) target_semaphore(%59 : memref<!tpu.dma_semaphore, #tpu.memory_space<semaphore_mem>>)
    %c7_i32 = arith.constant 7 : i32
    %60 = arith.addi %3, %c7_i32 : i32
    %61 = arith.index_cast %60 : i32 to index
    %62 = memref.load %arg2[%61] : memref<16xi32, #tpu.memory_space<smem>>
    %c0_i32_30 = arith.constant 0 : i32
    %c0_i32_31 = arith.constant 0 : i32
    %c0_i32_32 = arith.constant 0 : i32
    %63 = tpu.memref_slice %arg3[%62, %c0_i32_32] : memref<512x128xf32, #tpu.memory_space<any>> -> memref<1x128xf32, #tpu.memory_space<any>>
    %c0_i32_33 = arith.constant 0 : i32
    %64 = tpu.memref_slice %arg6[%c0_i32_30, %c7_i32, %c0_i32_33] : memref<2x8x128xf32, #tpu.memory_space<vmem>> -> memref<1x1x128xf32, #tpu.memory_space<vmem>>
    %65 = tpu.memref_squeeze %64 : memref<1x1x128xf32, #tpu.memory_space<vmem>> -> memref<1x128xf32, #tpu.memory_space<vmem>>
    %66 = tpu.memref_slice %arg7[%c0_i32_31] : memref<2x!tpu.dma_semaphore, #tpu.memory_space<semaphore_mem>> -> memref<1x!tpu.dma_semaphore, #tpu.memory_space<semaphore_mem>>
    %67 = tpu.memref_squeeze %66 : memref<1x!tpu.dma_semaphore, #tpu.memory_space<semaphore_mem>> -> memref<!tpu.dma_semaphore, #tpu.memory_space<semaphore_mem>>
    tpu.enqueue_dma source(%63 : memref<1x128xf32, #tpu.memory_space<any>>) target(%65 : memref<1x128xf32, #tpu.memory_space<vmem>>) target_semaphore(%67 : memref<!tpu.dma_semaphore, #tpu.memory_space<semaphore_mem>>)
    %c8_i32_34 = arith.constant 8 : i32
    %c0_i32_35 = arith.constant 0 : i32
    %c0_i32_36 = arith.constant 0 : i32
    %c0_i32_37 = arith.constant 0 : i32
    %c0_i32_38 = arith.constant 0 : i32
    %c0_i32_39 = arith.constant 0 : i32
    %68 = tpu.memref_slice %arg6[%c0_i32_35, %c0_i32_38, %c0_i32_39] : memref<2x8x128xf32, #tpu.memory_space<vmem>> -> memref<1x8x128xf32, #tpu.memory_space<vmem>>
    %69 = tpu.memref_squeeze %68 : memref<1x8x128xf32, #tpu.memory_space<vmem>> -> memref<8x128xf32, #tpu.memory_space<vmem>>
    %c0_i32_40 = arith.constant 0 : i32
    %c0_i32_41 = arith.constant 0 : i32
    %70 = tpu.memref_slice %arg6[%c0_i32_36, %c0_i32_40, %c0_i32_41] : memref<2x8x128xf32, #tpu.memory_space<vmem>> -> memref<1x8x128xf32, #tpu.memory_space<vmem>>
    %71 = tpu.memref_squeeze %70 : memref<1x8x128xf32, #tpu.memory_space<vmem>> -> memref<8x128xf32, #tpu.memory_space<vmem>>
    %72 = tpu.memref_slice %arg7[%c0_i32_37] : memref<2x!tpu.dma_semaphore, #tpu.memory_space<semaphore_mem>> -> memref<1x!tpu.dma_semaphore, #tpu.memory_space<semaphore_mem>>
    %73 = tpu.memref_squeeze %72 : memref<1x!tpu.dma_semaphore, #tpu.memory_space<semaphore_mem>> -> memref<!tpu.dma_semaphore, #tpu.memory_space<semaphore_mem>>
    tpu.wait_dma2 semaphore(%73 : memref<!tpu.dma_semaphore, #tpu.memory_space<semaphore_mem>>) src(%69 : memref<8x128xf32, #tpu.memory_space<vmem>>) dst(%71 : memref<8x128xf32, #tpu.memory_space<vmem>>)
    %c0 = arith.constant 0 : index
    %c0_42 = arith.constant 0 : index
    %c0_43 = arith.constant 0 : index
    %74 = vector.load %arg6[%c0, %c0_42, %c0_43] : memref<2x8x128xf32, #tpu.memory_space<vmem>>, vector<1x8x128xf32>
    %75 = vector.shape_cast %74 : vector<1x8x128xf32> to vector<8x128xf32>
    %c0_44 = arith.constant 0 : index
    %c0_45 = arith.constant 0 : index
    %76 = vector.load %arg4[%c0_44, %c0_45] : memref<8x128xf32, #tpu.memory_space<vmem>>, vector<8x128xf32>
    %77 = arith.addf %75, %76 : vector<8x128xf32>
    %c0_46 = arith.constant 0 : index
    %c0_47 = arith.constant 0 : index
    %c0_48 = arith.constant 0 : index
    %78 = vector.load %arg5[%c0_46, %c0_47, %c0_48] : memref<1x8x128xf32, #tpu.memory_space<vmem>>, vector<1x8x128xf32>
    %79 = vector.shape_cast %78 : vector<1x8x128xf32> to vector<8x128xf32>
    %80 = vector.shape_cast %77 : vector<8x128xf32> to vector<1x8x128xf32>
    tpu.vector_store %arg5[%c0_46, %c0_47, %c0_48], %80 {strides = array<i32>} : memref<1x8x128xf32, #tpu.memory_space<vmem>>, vector<1x8x128xf32>,
    return
  }
  func.func @transform_1(%arg0: i32, %arg1: i32, %arg2: memref<16xi32, #tpu.memory_space<smem>>) -> (i32, i32) {
    %c0_i32 = arith.constant 0 : i32
    %c0_i32_0 = arith.constant 0 : i32
    return %arg1, %c0_i32 : i32, i32
  }
  func.func @transform_2(%arg0: i32, %arg1: i32, %arg2: memref<16xi32, #tpu.memory_space<smem>>) -> (i32, i32, i32) {
    %c0_i32 = arith.constant 0 : i32
    %c0_i32_0 = arith.constant 0 : i32
    return %arg0, %arg1, %c0_i32 : i32, i32, i32
  }
}

</mosaic_0001>

<bundles_post_ra>
// kernel: gpt_embeddings_forward.1
= control target key start
LH: loop header
LB: loop body
LE: loop exit
PB: predicated region body
PF: predicated region fallthrough
CT: control target
= control target key end

     0   :  { %s1119_s0 = inlined_call_operand.vmem [shape: s32[16], index: 0, kind: input, shape index: {}]   ;;  %s1120_s1 = inlined_call_operand.hbm [shape: f32[512,128], index: 1, kind: input, shape index: {}]   ;;  %s1121_s2 = inlined_call_operand.hbm [shape: f32[32,128], index: 2, kind: input, shape index: {}]   ;;  %s1122_s3 = inlined_call_operand.hbm [shape: f32[2,8,128], index: 3, kind: output, shape index: {}]  }
   0x1   :  { %1130 = sst [smem:[#allocation34_spill]] %s1121_s2  ;;  %s8_s14 = sshll.u32 %s1119_s0, 4  ;;  %s9_s14 = int_to_ptr.vmem [resolvable:$true] %s8_s14 }
   0x2   :  { %s483_s15 = scalar_lea.vmem %s9_s14, 16  ;;  %p488_p1 = scmp.lt.s32.totalorder %s9_s14, %s9_s14 }
   0x3   :  { %p484_p0 = scmp.ne.s32.totalorder %s9_s14, %s483_s15  ;;  %p489_p2 = scmp.lt.s32.totalorder %s483_s15, %s483_s15 }
   0x5   :  { %p490_p3 = por %p489_p2, %p488_p1 }
   0x7   :  { %p491_p4 = pnand %p490_p3, %p484_p0 }
   0x9   :  { %494 = shalt.err (!%p491_p4)  }
   0xa   :  { %s803_s16 = smov [#allocation5]  }
   0xb   :  { %11 = dma.vmem_to_smem %s9_s14, 16, %s803_s16, [#allocation4] }
   0xc   :  { %767 = dma.done.wait [#allocation4], 16 }
   0xd   :  { %768 = vsyncadd [#allocation4], 4294967280 }
   0xe   :  { %13 = sfence }
   0xf   :  { %14 = vsyncpa [#allocation7], 0 }
  0x10   :  { %15 = vsyncpa [#allocation8], 0 }
  0x11   :  { %17 = vsyncpa [#allocation8 + $0x1], 0  ;;  %s837_s17 = smov 0   ;;  %s839_s18 = smov 0  }
  0x12   :  { %s841_s0 = smov 0   ;;  %s843_s19 = smov 0  }
  0x13   :  { %s845_s20 = smov 0   ;;  %s847_s21 = smov 0  }
  0x14 LB: > { %1131 = sst [smem:[#allocation32_spill]] %s797_s20  ;;  %s386_s22 = sadd.s32 4294967295, %s801_s21   ;;  %s801_s21 = sphi %s847_s21, %s23_s21   ;;  %s797_s20 = sphi %s845_s20, %s1145_s20   ;;  %s793_s19 = sphi %s843_s19, %s1144_s19   ;;  %s789_s0 = sphi %s841_s0, %s1148_s0   ;;  %s785_s18 = sphi %s839_s18, %s1147_s18   ;;  %s781_s17 = sphi %s837_s17, %s1146_s17  }
  0x15   : > { %s387_s23 = sadd.s32 4294967294, %s801_s21   ;;  %s35_s24 = sadd.s32 1, %s797_s20 }
  0x16   : > { %s70_s25 = sadd.s32 1, %s789_s0  ;;  %p37_p5 = scmp.ge.s32.totalorder %s35_s24, 2 }
  0x17   : > { %p80_p6 = scmp.ne.s32.totalorder %s789_s0, %s785_s18  ;;  %p81_p7 = scmp.eq.s32.totalorder %s386_s22, 1 }
  0x18   : > { %p86_p8 = scmp.ne.s32.totalorder %s785_s18, %s781_s17  ;;  %s1150_s24 = smov (%p37_p5, %s35_s24), 0 }
  0x19   : > { %1132 = sst [smem:[#allocation33_spill]] %s1150_s24  ;;  %p877_p9 = por %p81_p7, %p80_p6 }
  0x1a   : > { %p87_p10 = scmp.eq.s32.totalorder %s387_s23, 1  ;;  %s65_s27 = ssub.s32 %s797_s20, %s1150_s24 }
  0x1b   : > { %s1133_s26 = scalar_select %p877_p9, 1, 0 }
  0x1c   : > { %p388_p11 = scmp.ge.s32.totalorder %s801_s21, 1  ;;  %p68_p12 = scmp.eq.s32.totalorder %s65_s27, 0 }
  0x1d   : > { %p884_p13 = por %p87_p10, %p86_p8  ;;  %p94_p0 = scmp.lt.s32.totalorder %s801_s21, 3 }
  0x1e   : > { %s890_s29 = scalar_select %p68_p12, %s789_s0, %s70_s25  }
  0x1f   : > { %s1134_s28 = scalar_select %p884_p13, 1, 0 }
  0x20   : > { %p892_p1 = pnand %p388_p11, %p94_p0  ;;  %p896_p2 = scmp.eq.s32.totalorder %s386_s22, 0 }
  0x21   : > { %s804_s5 = smov [#allocation6]   ;;  %s1138_s2 = sld [smem:[#allocation34_spill]] }
  0x22   : > { %s1135_s30 = scalar_select %p892_p1, 1, 0 }
  0x23   : > { %s1136_s4 = scalar_select %p896_p2, 1, 0 }
  0x24   : > { %p414_p3 = pneg %p892_p1  ;;  %s109_s6 = sshll.u32 %s804_s5, 4  ;;  %s110_s6 = int_to_ptr.vmem [resolvable:$true] %s109_s6 }
  0x26   : > { %p904_p4 = pnand %p896_p2, %p414_p3 }
  0x27   : > { %s495_s10 = scalar_lea.hbm %s1138_s2, 128  ;;  %s500_s15 = scalar_lea.hbm %s1138_s2, 512 }
  0x28   : > { %p496_p5 = scmp.ne.s32.totalorder %s1138_s2, %s495_s10  ;;  %p497_p6 = pneg %p904_p4 }
  0x29   : > { %p501_p10 = scmp.lt.u32.totalorder %s500_s15, %s495_s10  ;;  %p502_p11 = scmp.lt.u32.totalorder %s495_s10, %s1138_s2 }
  0x2a   : > { %p498_p7 = pnand %p497_p6, %p496_p5 }
  0x2b   : > { %p503_p12 = por %p502_p11, %p501_p10 }
  0x2c   : > { %p499_p8 = pneg %p498_p7 }
  0x2e   : > { %p504_p0 = pnand %p503_p12, %p499_p8 }
  0x30   : > { %507 = shalt.err (!%p504_p0)
}
  0x31   : > { %s508_s23 = scalar_lea.vmem %s110_s6, 128  ;;  %p516_p2 = scmp.lt.s32.totalorder %s110_s6, %s110_s6 }
  0x32   : > { %p509_p3 = scmp.ne.s32.totalorder %s110_s6, %s508_s23  ;;  %p517_p1 = scmp.lt.s32.totalorder %s508_s23, %s508_s23 }
  0x34   : > { %p511_p13 = pnand %p509_p3, %p497_p6  ;;  %p518_p5 = por %p517_p1, %p516_p2 }
  0x36   : > { %p512_p9 = pneg %p511_p13 }
  0x38   : > { %p519_p7 = pnand %p518_p5, %p512_p9 }
  0x3a   : > { %522 = shalt.err (!%p519_p7)
}
  0x3b   : > { %417 = dma.hbm_to_vmem [thread:$0]  (!%p904_p4), %s1138_s2, 128, %s110_s6, [#allocation7]  }
  0x3c   : > { %p1139_p10 = scmp.ne.s32.totalorder %s1135_s30, 0 }
  0x3d   : > { %p1140_p8 = scmp.ne.s32.totalorder (!%p1139_p10), %s1136_s4, 0 }
  0x3e   : > { %122 = sbr.rel (%p1139_p10) target bundleno = 279 (0x117), region = 24 }
  0x45   : > { %770 = dma.done.wait (%p1140_p8), [#allocation7], 128  }
  0x46   : > { %772 = vsyncadd (%p1140_p8), [#allocation7], 4294967168  ;;  %s1127_s5 = sand.u32 1, %s785_s18   ;;  %s935_s8 = sshll.u32 %s793_s19, 3 }
  0x47   : > { %s939_s6 = sshll.u32 %s1127_s5, 3  ;;  %s139_s30 = sld [smem:[#allocation5 + %s935_s8]] }
  0x48   : > { %s805_s7 = smov [#allocation2]   ;;  %s153_s10 = sadd.s32 1, %s935_s8 }
  0x49   : > { %s149_s9 = sshll.u32 %s805_s7, 4  ;;  %s945_s4 = sld [smem:[#allocation5 + %s153_s10]]  ;;  %s943_s9 = int_to_ptr.vmem [resolvable:$true] %s149_s9 }
  0x4a   : > { %s169_s11 = sadd.s32 2, %s935_s8  ;;  %s806_s12 = smov [#allocation2 + $0x1]  }
  0x4b   : > { %s165_s13 = sshll.u32 %s806_s12, 4  ;;  %s948_s14 = sld [smem:[#allocation5 + %s169_s11]]  ;;  %s950_s13 = int_to_ptr.vmem [resolvable:$true] %s165_s13 }
  0x4c   : > { %s958_s5 = scalar_lea.hbm %s1120_s1, 8192 }
  0x4d   : > { %s394_s15 = sshll.u32 %s139_s30, 4 }
  0x4e   : > { %s141_s23 = scalar_lea.hbm %s1120_s1, %s394_s15 }
  0x4f   : > { %s523_s25 = scalar_lea.hbm %s141_s23, 16  ;;  %p526_p13 = scmp.lt.u32.totalorder %s141_s23, %s1120_s1 }
  0x50   : > { %p524_p9 = scmp.ne.s32.totalorder %s141_s23, %s523_s25  ;;  %p527_p1 = scmp.lt.u32.totalorder %s958_s5, %s523_s25 }
  0x51   : > { %p529_p4 = scmp.lt.u32.totalorder %s523_s25, %s141_s23 }
  0x52   : > { %p528_p2 = por %p527_p1, %p526_p13 }
  0x54   : > { %p530_p6 = por %p529_p4, %p528_p2 }
  0x56   : > { %p531_p11 = pnand %p530_p6, %p524_p9 }
  0x58   : > { %534 = shalt.err (!%p531_p11)  }
  0x59   : > { %s535_s30 = scalar_lea.vmem %s943_s9, 16  ;;  %s967_s11 = scalar_lea.vmem %s943_s9, 256 }
  0x5a   : > { %p536_p12 = scmp.ne.s32.totalorder %s943_s9, %s535_s30  ;;  %p540_p0 = scmp.lt.s32.totalorder %s943_s9, %s943_s9 }
  0x5b   : > { %p541_p3 = scmp.lt.s32.totalorder %s967_s11, %s535_s30 }
  0x5d   : > { %p542_p5 = por %p541_p3, %p540_p0 }
  0x5f   : > { %p543_p7 = pnand %p542_p5, %p536_p12 }
  0x61   : > { %546 = shalt.err (!%p543_p7)  }
  0x62   : > { %152 = dma.hbm_to_vmem [thread:$0]  %s141_s23, 16, %s943_s9, [#allocation3] }
  0x63   : > { %s395_s2 = sshll.u32 %s945_s4, 4  ;;  %s807_s12 = smov [#allocation2 + $0x2]  }
  0x64   : > { %s181_s15 = sshll.u32 %s807_s12, 4  ;;  %s156_s25 = scalar_lea.hbm %s1120_s1, %s395_s2  ;;  %s977_s15 = int_to_ptr.vmem [resolvable:$true] %s181_s15 }
  0x65   : > { %s547_s27 = scalar_lea.hbm %s156_s25, 16  ;;  %p550_p8 = scmp.lt.u32.totalorder %s156_s25, %s1120_s1 }
  0x66   : > { %p548_p10 = scmp.ne.s32.totalorder %s156_s25, %s547_s27  ;;  %p551_p9 = scmp.lt.u32.totalorder %s958_s5, %s547_s27 }
  0x67   : > { %p553_p1 = scmp.lt.u32.totalorder %s547_s27, %s156_s25 }
  0x68   : > { %p552_p13 = por %p551_p9, %p550_p8 }
  0x6a   : > { %p554_p2 = por %p553_p1, %p552_p13 }
  0x6c   : > { %p555_p4 = pnand %p554_p2, %p548_p10 }
  0x6e   : > { %558 = shalt.err (!%p555_p4)  }
  0x6f   : > { %s559_s4 = scalar_lea.vmem %s950_s13, 16  ;;  %p564_p11 = scmp.lt.s32.totalorder %s950_s13, %s943_s9 }
  0x70   : > { %p560_p6 = scmp.ne.s32.totalorder %s950_s13, %s559_s4  ;;  %p565_p12 = scmp.lt.s32.totalorder %s967_s11, %s559_s4 }
  0x72   : > { %p566_p0 = por %p565_p12, %p564_p11 }
  0x74   : > { %p567_p3 = pnand %p566_p0, %p560_p6 }
  0x76   : > { %570 = shalt.err (!%p567_p3)  }
  0x77   : > { %168 = dma.hbm_to_vmem [thread:$0]  %s156_s25, 16, %s950_s13, [#allocation3] }
  0x78   : > { %s396_s23 = sshll.u32 %s948_s14, 4  ;;  %s185_s30 = sadd.s32 3, %s935_s8 }
  0x79   : > { %s172_s16 = scalar_lea.hbm %s1120_s1, %s396_s23  ;;  %s994_s22 = sld [smem:[#allocation5 + %s185_s30]] }
  0x7a   : > { %s571_s27 = scalar_lea.hbm %s172_s16, 16  ;;  %p574_p7 = scmp.lt.u32.totalorder %s172_s16, %s1120_s1 }
  0x7b   : > { %p572_p5 = scmp.ne.s32.totalorder %s172_s16, %s571_s27  ;;  %p575_p10 = scmp.lt.u32.totalorder %s958_s5, %s571_s27 }
  0x7c   : > { %p577_p9 = scmp.lt.u32.totalorder %s571_s27, %s172_s16 }
  0x7d   : > { %p576_p8 = por %p575_p10, %p574_p7 }
  0x7f   : > { %p578_p13 = por %p577_p9, %p576_p8 }
  0x81   : > { %p579_p1 = pnand %p578_p13, %p572_p5 }
  0x83   : > { %582 = shalt.err (!%p579_p1)  }
  0x84   : > { %s583_s13 = scalar_lea.vmem %s977_s15, 16  ;;  %p588_p4 = scmp.lt.s32.totalorder %s977_s15, %s943_s9 }
  0x85   : > { %p584_p2 = scmp.ne.s32.totalorder %s977_s15, %s583_s13  ;;  %p589_p6 = scmp.lt.s32.totalorder %s967_s11, %s583_s13 }
  0x87   : > { %p590_p11 = por %p589_p6, %p588_p4 }
  0x89   : > { %p591_p12 = pnand %p590_p11, %p584_p2 }
  0x8b   : > { %594 = shalt.err (!%p591_p12)  }
  0x8c   : > { %184 = dma.hbm_to_vmem [thread:$0]  %s172_s16, 16, %s977_s15, [#allocation3] }
  0x8d   : > { %s201_s14 = sadd.s32 4, %s935_s8  ;;  %s808_s25 = smov [#allocation2 + $0x3]  }
  0x8e   : > { %s197_s4 = sshll.u32 %s808_s25, 4  ;;  %s202_s23 = sld [smem:[#allocation5 + %s201_s14]]  ;;  %s198_s4 = int_to_ptr.vmem [resolvable:$true] %s197_s4 }
  0x8f   : > { %s809_s30 = smov [#allocation2 + $0x4]   ;;  %s217_s12 = sadd.s32 5, %s935_s8 }
  0x90   : > { %s213_s2 = sshll.u32 %s809_s30, 4  ;;  %s397_s27 = sshll.u32 %s994_s22, 4  ;;  %s1009_s2 = int_to_ptr.vmem [resolvable:$true] %s213_s2 }
  0x91   : > { %s188_s13 = scalar_lea.hbm %s1120_s1, %s397_s27  ;;  %s1014_s24 = sld [smem:[#allocation5 + %s217_s12]] }
  0x92   : > { %s595_s20 = scalar_lea.hbm %s188_s13, 16  ;;  %p598_p3 = scmp.lt.u32.totalorder %s188_s13, %s1120_s1 }
  0x93   : > { %p596_p0 = scmp.ne.s32.totalorder %s188_s13, %s595_s20  ;;  %p599_p5 = scmp.lt.u32.totalorder %s958_s5, %s595_s20 }
  0x94   : > { %p601_p10 = scmp.lt.u32.totalorder %s595_s20, %s188_s13 }
  0x95   : > { %p600_p7 = por %p599_p5, %p598_p3 }
  0x97   : > { %p602_p8 = por %p601_p10, %p600_p7 }
  0x99   : > { %p603_p9 = pnand %p602_p8, %p596_p0 }
  0x9b   : > { %606 = shalt.err (!%p603_p9)  }
  0x9c   : > { %s607_s22 = scalar_lea.vmem %s198_s4, 16  ;;  %p612_p1 = scmp.lt.s32.totalorder %s198_s4, %s943_s9 }
  0x9d   : > { %p608_p13 = scmp.ne.s32.totalorder %s198_s4, %s607_s22  ;;  %p613_p2 = scmp.lt.s32.totalorder %s967_s11, %s607_s22 }
  0x9f   : > { %p614_p4 = por %p613_p2, %p612_p1 }
  0xa1   : > { %p615_p6 = pnand %p614_p4, %p608_p13 }
  0xa3   : > { %618 = shalt.err (!%p615_p6)  }
  0xa4   : > { %200 = dma.hbm_to_vmem [thread:$0]  %s188_s13, 16, %s198_s4, [#allocation3] }
  0xa5   : > { %s398_s14 = sshll.u32 %s202_s23, 4  ;;  %s810_s20 = smov [#allocation2 + $0x5]  }
  0xa6   : > { %s204_s12 = scalar_lea.hbm %s1120_s1, %s398_s14  ;;  %s229_s27 = sshll.u32 %s810_s20, 4  ;;  %s230_s27 = int_to_ptr.vmem [resolvable:$true] %s229_s27 }
  0xa7   : > { %s619_s7 = scalar_lea.hbm %s204_s12, 16  ;;  %p622_p12 = scmp.lt.u32.totalorder %s204_s12, %s1120_s1 }
  0xa8   : > { %p620_p11 = scmp.ne.s32.totalorder %s204_s12, %s619_s7  ;;  %p623_p0 = scmp.lt.u32.totalorder %s958_s5, %s619_s7 }
  0xa9   : > { %p625_p5 = scmp.lt.u32.totalorder %s619_s7, %s204_s12 }
  0xaa   : > { %p624_p3 = por %p623_p0, %p622_p12 }
  0xac   : > { %p626_p7 = por %p625_p5, %p624_p3 }
  0xae   : > { %p627_p10 = pnand %p626_p7, %p620_p11 }
  0xb0   : > { %630 = shalt.err (!%p627_p10)  }
  0xb1   : > { %s631_s4 = scalar_lea.vmem %s1009_s2, 16  ;;  %p636_p9 = scmp.lt.s32.totalorder %s1009_s2, %s943_s9 }
  0xb2   : > { %p632_p8 = scmp.ne.s32.totalorder %s1009_s2, %s631_s4  ;;  %p637_p13 = scmp.lt.s32.totalorder %s967_s11, %s631_s4 }
  0xb4   : > { %p638_p1 = por %p637_p13, %p636_p9 }
  0xb6   : > { %p639_p2 = pnand %p638_p1, %p632_p8 }
  0xb8   : > { %642 = shalt.err (!%p639_p2)  }
  0xb9   : > { %216 = dma.hbm_to_vmem [thread:$0]  %s204_s12, 16, %s1009_s2, [#allocation3] }
  0xba   : > { %s233_s23 = sadd.s32 6, %s935_s8  ;;  %s399_s13 = sshll.u32 %s1014_s24, 4 }
  0xbb   : > { %s234_s16 = sld [smem:[#allocation5 + %s233_s23]]  ;;  %s220_s25 = scalar_lea.hbm %s1120_s1, %s399_s13 }
  0xbc   : > { %s643_s30 = scalar_lea.hbm %s220_s25, 16  ;;  %p646_p6 = scmp.lt.u32.totalorder %s220_s25, %s1120_s1 }
  0xbd   : > { %p644_p4 = scmp.ne.s32.totalorder %s220_s25, %s643_s30  ;;  %p647_p11 = scmp.lt.u32.totalorder %s958_s5, %s643_s30 }
  0xbe   : > { %p649_p0 = scmp.lt.u32.totalorder %s643_s30, %s220_s25 }
  0xbf   : > { %p648_p12 = por %p647_p11, %p646_p6 }
  0xc1   : > { %p650_p3 = por %p649_p0, %p648_p12 }
  0xc3   : > { %p651_p5 = pnand %p650_p3, %p644_p4 }
  0xc5   : > { %654 = shalt.err (!%p651_p5)  }
  0xc6   : > { %s655_s2 = scalar_lea.vmem %s230_s27, 16  ;;  %p660_p10 = scmp.lt.s32.totalorder %s230_s27, %s943_s9 }
  0xc7   : > { %p656_p7 = scmp.ne.s32.totalorder %s230_s27, %s655_s2  ;;  %p661_p8 = scmp.lt.s32.totalorder %s967_s11, %s655_s2 }
  0xc9   : > { %p662_p9 = por %p661_p8, %p660_p10 }
  0xcb   : > { %p663_p13 = pnand %p662_p9, %p656_p7 }
  0xcd   : > { %666 = shalt.err (!%p663_p13)  }
  0xce   : > { %232 = dma.hbm_to_vmem [thread:$0]  %s220_s25, 16, %s230_s27, [#allocation3] }
  0xcf   : > { %s811_s24 = smov [#allocation2 + $0x6]   ;;  %s249_s10 = sadd.s32 7, %s935_s8 }
  0xd0   : > { %s245_s12 = sshll.u32 %s811_s24, 4  ;;  %s250_s15 = sld [smem:[#allocation5 + %s249_s10]]  ;;  %s246_s12 = int_to_ptr.vmem [resolvable:$true] %s245_s12 }
  0xd1   : > { %s400_s4 = sshll.u32 %s234_s16, 4  ;;  %s812_s23 = smov [#allocation2 + $0x7]  }
  0xd2   : > { %s261_s13 = sshll.u32 %s812_s23, 4  ;;  %s236_s30 = scalar_lea.hbm %s1120_s1, %s400_s4  ;;  %s262_s13 = int_to_ptr.vmem [resolvable:$true] %s261_s13 }
  0xd3   : > { %s667_s20 = scalar_lea.hbm %s236_s30, 16  ;;  %p670_p2 = scmp.lt.u32.totalorder %s236_s30, %s1120_s1 }
  0xd4   : > { %p668_p1 = scmp.ne.s32.totalorder %s236_s30, %s667_s20  ;;  %p671_p4 = scmp.lt.u32.totalorder %s958_s5, %s667_s20 }
  0xd5   : > { %p673_p11 = scmp.lt.u32.totalorder %s667_s20, %s236_s30 }
  0xd6   : > { %p672_p6 = por %p671_p4, %p670_p2 }
  0xd8   : > { %p674_p12 = por %p673_p11, %p672_p6 }
  0xda   : > { %p675_p0 = pnand %p674_p12, %p668_p1 }
  0xdc   : > { %678 = shalt.err (!%p675_p0)  }
  0xdd   : > { %s679_s8 = scalar_lea.vmem %s246_s12, 16  ;;  %p684_p5 = scmp.lt.s32.totalorder %s246_s12, %s943_s9 }
  0xde   : > { %p680_p3 = scmp.ne.s32.totalorder %s246_s12, %s679_s8  ;;  %p685_p7 = scmp.lt.s32.totalorder %s967_s11, %s679_s8 }
  0xe0   : > { %p686_p10 = por %p685_p7, %p684_p5 }
  0xe2   : > { %p687_p8 = pnand %p686_p10, %p680_p3 }
  0xe4   : > { %690 = shalt.err (!%p687_p8)  }
  0xe5   : > { %248 = dma.hbm_to_vmem [thread:$0]  %s236_s30, 16, %s246_s12, [#allocation3] }
  0xe6   : > { %s401_s27 = sshll.u32 %s250_s15, 4 }
  0xe7   : > { %s252_s24 = scalar_lea.hbm %s1120_s1, %s401_s27 }
  0xe8   : > { %s691_s10 = scalar_lea.hbm %s252_s24, 16  ;;  %p694_p13 = scmp.lt.u32.totalorder %s252_s24, %s1120_s1 }
  0xe9   : > { %p692_p9 = scmp.ne.s32.totalorder %s252_s24, %s691_s10  ;;  %p695_p1 = scmp.lt.u32.totalorder %s958_s5, %s691_s10 }
  0xea   : > { %p697_p4 = scmp.lt.u32.totalorder %s691_s10, %s252_s24 }
  0xeb   : > { %p696_p2 = por %p695_p1, %p694_p13 }
  0xed   : > { %p698_p6 = por %p697_p4, %p696_p2 }
  0xef   : > { %p699_p11 = pnand %p698_p6, %p692_p9 }
  0xf1   : > { %702 = shalt.err (!%p699_p11)  }
  0xf2   : > { %s703_s12 = scalar_lea.vmem %s262_s13, 16  ;;  %p708_p0 = scmp.lt.s32.totalorder %s262_s13, %s943_s9 }
  0xf3   : > { %p704_p12 = scmp.ne.s32.totalorder %s262_s13, %s703_s12  ;;  %p709_p3 = scmp.lt.s32.totalorder %s967_s11, %s703_s12 }
  0xf5   : > { %p710_p5 = por %p709_p3, %p708_p0 }
  0xf7   : > { %p711_p7 = pnand %p710_p5, %p704_p12 }
  0xf9   : > { %714 = shalt.err (!%p711_p7)  }
  0xfa   : > { %264 = dma.hbm_to_vmem [thread:$0]  %s252_s24, 16, %s262_s13, [#allocation3] }
  0xfb   : > { %s136_s15 = scalar_lea.vmem [#allocation9], %s939_s6 }
  0xfc   : > { %773 = dma.done.wait [#allocation3], 128 }
  0xfd   : > { %774 = vsyncadd [#allocation3], 4294967168  ;;  %s403_s5 = sshll.u32 %s793_s19, 7  ;;  %s287_s22 = sshll.u32 %s136_s15, 4  ;;  %v268_v0 = vld [vmem:[#allocation2] sm:$0xff]  ;;  %v269_v1 = vld [vmem:[#allocation6] sm:$0xff]  ;;  %s1072_s22 = int_to_ptr.vmem [resolvable:$true] %s287_s22 }
  0xfe   : > { %v270_v2 = vadd.f32 %v269_v1, %v268_v0  ;;  %s1070_s9 = scalar_lea.hbm %s1122_s3, %s403_s5  ;;  %s1141_s6 = sand.u32 1, %s785_s18  }
  0xff   : > { %s273_s11 = scalar_lea.sflag [#allocation8], %s1141_s6  ;;  %s715_s13 = scalar_lea.vmem %s1072_s22, 128 }
 0x100   : > { %271 = vst [vmem:[%s136_s15] sm:$0xff] %v270_v2  ;;  %p716_p10 = scmp.ne.s32.totalorder %s1072_s22, %s715_s13  ;;  %p1142_p8 = scmp.ne.s32.totalorder %s1133_s26, 0 }
 0x101   : > { %s813_s19 = smov [#allocation9]  }
 0x102   : > { %p717_p9 = pnand %p716_p10, %p1142_p8  ;;  %s719_s20 = sshll.u32 %s813_s19, 4  ;;  %s720_s20 = int_to_ptr.vmem [resolvable:$false] %s719_s20 }
 0x103   : > { %s721_s7 = scalar_lea.vmem %s720_s20, 256  ;;  %p722_p1 = scmp.lt.s32.totalorder %s1072_s22, %s720_s20 }
 0x104   : > { %p718_p13 = pneg %p717_p9  ;;  %p723_p2 = scmp.lt.s32.totalorder %s721_s7, %s715_s13 }
 0x106   : > { %p724_p4 = por %p723_p2, %p722_p1 }
 0x108   : > { %p725_p6 = pnand %p724_p4, %p718_p13 }
 0x10a   : > { %728 = shalt.err (!%p725_p6)
}
 0x10b   : > { %s729_s2 = scalar_lea.hbm %s1070_s9, 128  ;;  %s733_s16 = scalar_lea.hbm %s1122_s3, 256 }
 0x10c   : > { %p730_p11 = scmp.ne.s32.totalorder %s1070_s9, %s729_s2  ;;  %p734_p3 = scmp.lt.u32.totalorder %s1070_s9, %s1122_s3 }
 0x10d   : > { %p735_p5 = scmp.lt.u32.totalorder %s733_s16, %s729_s2  ;;  %p737_p10 = scmp.lt.u32.totalorder %s729_s2, %s1070_s9 }
 0x10e   : > { %p731_p12 = pnand %p730_p11, %p1142_p8 }
 0x10f   : > { %p736_p7 = por %p735_p5, %p734_p3 }
 0x110   : > { %p732_p0 = pneg %p731_p12 }
 0x111   : > { %p738_p9 = por %p737_p10, %p736_p7 }
 0x113   : > { %p739_p13 = pnand %p738_p9, %p732_p0 }
 0x115   : > { %742 = shalt.err (!%p739_p13)
}
 0x116   : > { %412 = dma.vmem_to_hbm [thread:$0]  (%p1142_p8), %s1072_s22, 128, %s1070_s9, %s273_s11  }
 0x117 PF: > { %p424_p1 = scmp.ge.s32.totalorder %s801_s21, 2  ;;  %s299_s10 = sand.u32 1, %s781_s17  }
 0x118   : > { %p1143_p2 = scmp.ne.s32.totalorder %s1134_s28, 0  ;;  %s300_s4 = scalar_lea.sflag [#allocation8], %s299_s10 }
 0x11a   : > { %p419_p4 = pnand %p424_p1, %p1143_p2 }
 0x11c   : > { %776 = dma.done.wait (!%p419_p4), %s300_s4, 128  }
 0x11d   : > { %778 = vsyncadd (!%p419_p4), %s300_s4, 4294967168  ;;  %s23_s21 = sadd.s32 1, %s801_s21   ;;  %s1144_s19 = sld [smem:[#allocation32_spill]] }
 0x11e   : > { %p20_p6 = scmp.ge.s32.totalorder %s23_s21, 4   ;;  %s1145_s20 = sld [smem:[#allocation33_spill]] }
 0x11f   : > { %s1146_s17 = smov %s785_s18  ;;  %s1147_s18 = smov %s789_s0 }
 0x120   : > { %s1148_s0 = smov %s890_s29  ;;  %22 = sbr.rel (!%p20_p6) target bundleno = 20 (0x14), region = 110 }
 0x127   :  { %305 = vsyncpa [#allocation7], 1 }
 0x128   :  { %307 = vsyncpa [#allocation7 + $0x1], 1 }
 0x129   :  { %308 = vsyncpa [#allocation8], 1 }
 0x12a   :  { %310 = vsyncpa [#allocation8 + $0x1], 1 }
 0x12b   :  { %311 = vsyncmov [#allocation3] }
 0x12e   :  { %s312_s26 = vpop.sfrf %311 }
 0x12f   :  { %p406_p8 = scmp.ne.s32.totalorder %s312_s26, 0 }
 0x131   :  { %316 = shalt.err (%p406_p8)  }
 0x132   :  { %318 = vsyncmov [#allocation3 + $0x1] }
 0x135   :  { %s319_s28 = vpop.sfrf %318 }
 0x136   :  { %p407_p11 = scmp.ne.s32.totalorder %s319_s28, 0 }
 0x138   :  { %323 = shalt.err (%p407_p11)  }

</bundles_post_ra>
